<compile_context>
chip_gen: v7x
topology: tpu7x:2x2x1
jax: 0.10.0
libtpu: 0.0.40
codegen_flags: <defaults>
</compile_context>

<pallas_src>
from functools import partial

import jax
import jax.numpy as jnp
from jax.experimental import pallas as pl
from jax.experimental.pallas import tpu as pltpu


def _round_up(x, m):
    return ((x + m - 1) // m) * m


def _sublane_multiple(itemsize):
    # Packed-row multiple on the sublane axis: f32 -> 8, bf16 -> 16, int8/fp8 -> 32.
    return {4: 8, 2: 16, 1: 32}.get(int(itemsize), 8)


def _device_info():
    """(vmem_capacity_bytes, num_tensorcores, default_target_block_bytes)."""
    vmem_cap = 64 << 20          # conservative: v7x has the smallest VMEM
    num_cores = 1                # v5e / v6e are single-TC chips
    target = 2 << 20             # ~2 MiB blocks hit ~85% of HBM roofline
    try:
        info = pltpu.get_tpu_info()
        vmem_cap = int(getattr(info, "vmem_capacity_bytes", vmem_cap))
    except Exception:
        pass
    try:
        kind = jax.devices()[0].device_kind.lower()
    except Exception:
        kind = ""
    if any(t in kind for t in ("v7", "7x", "v4", "v3")):
        num_cores = 2            # 2 TensorCores share the grid via "parallel"
    if any(t in kind for t in ("v7", "7x")):
        target = 4 << 20         # higher HBM BW -> bigger blocks amortize step cost
    return vmem_cap, num_cores, target


def _choose_row_tile(nc, hw, itemsize, target_bytes, num_cores, min_steps):
    """Row tile for the (NC, HW) layout: dtype-aligned, ~target_bytes blocks."""
    sub = _sublane_multiple(itemsize)
    row_bytes = max(hw * itemsize, 1)
    rows_cap = _round_up(nc, sub)
    rows = max(sub, (target_bytes // row_bytes) // sub * sub)
    rows = min(rows, rows_cap)
    # Guarantee a few grid steps when NC allows: grid == 1 means DMA-in /
    # compute / DMA-out fully serialize (no software pipelining at all).
    if nc >= min_steps * sub:
        rows = min(rows, max(sub, (nc // min_steps) // sub * sub))
    # On 2-TC chips prefer an even grid so both cores get balanced shards.
    grid = pl.cdiv(nc, rows)
    if num_cores >= 2 and grid > 1 and grid % 2 == 1:
        alt = max(sub, _round_up(pl.cdiv(nc, grid + 1), sub))
        if pl.cdiv(nc, alt) % 2 == 0:
            rows = alt
    return rows


def _choose_sample_tile(n, plane_bytes, target_bytes, num_cores, min_steps):
    """Samples-per-block for the (N, HW, C) channels-on-lanes layout."""
    gs = max(1, target_bytes // max(plane_bytes, 1))
    gs = min(gs, n)
    if n >= min_steps:
        gs = min(gs, max(1, n // min_steps))
    grid = pl.cdiv(n, gs)
    if num_cores >= 2 and grid > 1 and grid % 2 == 1:
        alt = max(1, pl.cdiv(n, grid + 1))
        if pl.cdiv(n, alt) % 2 == 0:
            gs = alt
    return gs


def _frn_kernel_rows(x_ref, p_ref, o_ref, *, eps):
    # x_ref: (TR, HW) tile; p_ref: (TR, 3) packed [gamma, beta, tau] per row.
    x = x_ref[...].astype(jnp.float32)
    p = p_ref[...]
    gamma = p[:, 0:1]
    beta = p[:, 1:2]
    tau = p[:, 2:3]
    nu2 = jnp.mean(x * x, axis=-1, keepdims=True)        # per-row spatial mean
    scale = gamma * jax.lax.rsqrt(nu2 + eps)              # fold gamma into scale
    o_ref[...] = jnp.maximum(x * scale + beta, tau).astype(o_ref.dtype)


def _frn_kernel_nhwc(x_ref, p_ref, o_ref, *, eps):
    # x_ref: (GS, HW, C) tile (C on lanes); p_ref: (3, C) = [gamma; beta; tau].
    x = x_ref[...].astype(jnp.float32)
    p = p_ref[...]
    gamma = p[0][None, None, :]
    beta = p[1][None, None, :]
    tau = p[2][None, None, :]
    nu2 = jnp.mean(x * x, axis=1, keepdims=True)          # (GS, 1, C) sublane reduce
    scale = gamma * jax.lax.rsqrt(nu2 + eps)
    o_ref[...] = jnp.maximum(x * scale + beta, tau).astype(o_ref.dtype)


def filter_response_norm(x, gamma, beta, tau, eps=1e-6, data_format="NCHW",
                         target_block_bytes=None):
    """FRN forward. x: (N,C,H,W) ["NCHW"] or (N,H,W,C) ["NHWC"];
    gamma/beta/tau: (1, C, 1, 1). Returns the same layout as the input."""
    vmem_cap, num_cores, default_target = _device_info()
    target = int(target_block_bytes) if target_block_bytes else default_target
    min_steps = 3 if num_cores < 2 else 4

    if data_format == "NHWC":
        N, H, W, C = x.shape
    else:
        N, C, H, W = x.shape
    HW = H * W
    itemsize = x.dtype.itemsize

    gamma_c = gamma.reshape(C).astype(jnp.float32)
    beta_c = beta.reshape(C).astype(jnp.float32)
    tau_c = tau.reshape(C).astype(jnp.float32)

    # ---------------- channels-on-lanes path (NHWC callers) ----------------
    if data_format == "NHWC":
        plane_bytes = HW * C * itemsize
        if 4 * plane_bytes <= int(0.5 * vmem_cap):
            x2 = x.reshape(N, HW, C)
            params = jnp.stack([gamma_c, beta_c, tau_c], axis=0)      # (3, C)
            gs = _choose_sample_tile(N, plane_bytes, target, num_cores, min_steps)
            grid = (pl.cdiv(N, gs),)
            block_bytes = gs * plane_bytes
            need = 4 * block_bytes + 2 * 3 * C * 4 + (1 << 20)
            vmem_limit = int(min(max(32 << 20, need), int(0.75 * vmem_cap)))
            cost = pl.CostEstimate(
                flops=5 * N * C * HW,
                transcendentals=N * C,
                bytes_accessed=2 * N * C * HW * itemsize + 3 * C * 4,
            )
            out = pl.pallas_call(
                partial(_frn_kernel_nhwc, eps=float(eps)),
                out_shape=jax.ShapeDtypeStruct((N, HW, C), x.dtype),
                grid_spec=pltpu.PrefetchScalarGridSpec(
                    num_scalar_prefetch=0,
                    grid=grid,
                    in_specs=[
                        pl.BlockSpec((gs, HW, C), lambda i: (i, 0, 0)),
                        pl.BlockSpec((3, C), lambda i: (0, 0)),
                    ],
                    out_specs=pl.BlockSpec((gs, HW, C), lambda i: (i, 0, 0)),
                ),
                compiler_params=pltpu.CompilerParams(
                    dimension_semantics=("parallel",),
                    vmem_limit_bytes=vmem_limit,
                ),
                cost_estimate=cost,
            )(x2, params)
            return out.reshape(N, H, W, C)
        # TODO(synk): HW-chunked two-pass reduction for NHWC planes too large
        # for a single VMEM block; for now fall back through an extra HBM pass.
        x = jnp.transpose(x, (0, 3, 1, 2))

    # ---------------------- rows path (NCHW layout) -------------------------
    NC = N * C
    x2 = x.reshape(NC, HW)                                # native dtype in HBM
    params = jnp.broadcast_to(
        jnp.stack([gamma_c, beta_c, tau_c], axis=-1)[None], (N, C, 3)
    ).reshape(NC, 3)                                      # (NC, 3) packed f32

    tr = _choose_row_tile(NC, HW, itemsize, target, num_cores, min_steps)
    grid = (pl.cdiv(NC, tr),)                             # partial last block safe

    block_bytes = tr * HW * itemsize
    n_buf = 2
    if 4 * block_bytes > int(0.6 * vmem_cap):
        # Huge spatial planes: single-buffer so in+out blocks still fit VMEM.
        # TODO(synk): HW-chunked reduction grid axis (accumulate sum(x^2),
        # normalize in a finalize pass) for planes exceeding VMEM even then.
        n_buf = 1
    need = 2 * n_buf * block_bytes + 2 * tr * 3 * 4 + (1 << 20)
    vmem_limit = int(min(max(32 << 20, need), int(0.75 * vmem_cap)))

    cost = pl.CostEstimate(
        flops=5 * NC * HW,
        transcendentals=NC,
        bytes_accessed=2 * NC * HW * itemsize + NC * 3 * 4,
    )

    pm = {} if n_buf == 2 else {"pipeline_mode": pl.Buffered(1)}
    out = pl.pallas_call(
        partial(_frn_kernel_rows, eps=float(eps)),
        out_shape=jax.ShapeDtypeStruct((NC, HW), x.dtype),
        grid_spec=pltpu.PrefetchScalarGridSpec(
            num_scalar_prefetch=0,
            grid=grid,
            in_specs=[
                pl.BlockSpec((tr, HW), lambda i: (i, 0), **pm),
                pl.BlockSpec((tr, 3), lambda i: (i, 0)),
            ],
            out_specs=pl.BlockSpec((tr, HW), lambda i: (i, 0), **pm),
        ),
        compiler_params=pltpu.CompilerParams(
            dimension_semantics=("parallel",),
            vmem_limit_bytes=vmem_limit,
        ),
        cost_estimate=cost,
    )(x2, params)

    out = out.reshape(N, C, H, W)
    if data_format == "NHWC":
        return jnp.transpose(out, (0, 2, 3, 1))
    return out


if __name__ == "__main__":
    # --- Primary test: module-shaped NCHW example (batch=2, C=4, 16x16). ---
    key = jax.random.PRNGKey(0)
    N, C, H, W = 2, 4, 16, 16
    x = jax.random.normal(key, (N, C, H, W), dtype=jnp.float32)

    # Parameters exactly as the PyTorch module's __init__ (tau/beta zeros, gamma ones).
    tau = jnp.zeros((1, C, 1, 1), dtype=jnp.float32)
    beta = jnp.zeros((1, C, 1, 1), dtype=jnp.float32)
    gamma = jnp.ones((1, C, 1, 1), dtype=jnp.float32)

    z = filter_response_norm(x, gamma, beta, tau, eps=1e-6)
    z = jax.block_until_ready(z)

    nu2 = jnp.mean(jnp.square(x), axis=(2, 3), keepdims=True)
    ref = jnp.maximum(gamma * (x / jnp.sqrt(nu2 + 1e-6)) + beta, tau)
    assert jnp.allclose(z, ref, atol=1e-5, rtol=1e-5), "NCHW path mismatch"

    # --- Secondary test: lane-dense channels-on-lanes path (NHWC, C=128, 7x7). ---
    k1, k2, k3, k4 = jax.random.split(jax.random.PRNGKey(0), 4)
    N2, C2, H2, W2 = 4, 128, 7, 7
    x2 = jax.random.normal(k1, (N2, H2, W2, C2), dtype=jnp.float32)
    g2 = 1.0 + 0.1 * jax.random.normal(k2, (1, C2, 1, 1), dtype=jnp.float32)
    b2 = 0.1 * jax.random.normal(k3, (1, C2, 1, 1), dtype=jnp.float32)
    t2 = 0.05 * jax.random.normal(k4, (1, C2, 1, 1), dtype=jnp.float32)

    z2 = filter_response_norm(x2, g2, b2, t2, eps=1e-6, data_format="NHWC")
    z2 = jax.block_until_ready(z2)

    x2_nchw = jnp.transpose(x2, (0, 3, 1, 2))
    nu2b = jnp.mean(jnp.square(x2_nchw), axis=(2, 3), keepdims=True)
    ref2 = jnp.maximum(g2 * (x2_nchw / jnp.sqrt(nu2b + 1e-6)) + b2, t2)
    ref2 = jnp.transpose(ref2, (0, 2, 3, 1))
    assert jnp.allclose(z2, ref2, atol=1e-5, rtol=1e-5), "NHWC path mismatch"

    print("KERNEL_OK")
</pallas_src>

<mosaic_0001>
module attributes {stable_mosaic.version = 11 : i64} {
  func.func @_frn_kernel_rows(%arg0: i32, %arg1: memref<8x256xf32, #tpu.memory_space<vmem>>, %arg2: memref<8x3xf32, #tpu.memory_space<vmem>>, %arg3: memref<8x256xf32, #tpu.memory_space<vmem>>) attributes {dimension_semantics = [#tpu.dimension_semantics<parallel>], iteration_bounds = array<i64: 1>, scalar_prefetch = 0 : i64, scratch_operands = 0 : i64, tpu.core_type = #tpu.core_type<tc>, window_params = [{transform_indices = @transform_0, window_bounds = array<i64: 8, 256>}, {transform_indices = @transform_1, window_bounds = array<i64: 8, 3>}, {transform_indices = @transform_2, window_bounds = array<i64: 8, 256>}]} {
    %c0 = arith.constant 0 : index
    %c0_0 = arith.constant 0 : index
    %0 = vector.load %arg1[%c0, %c0_0] : memref<8x256xf32, #tpu.memory_space<vmem>>, vector<8x256xf32>
    %c0_1 = arith.constant 0 : index
    %c0_2 = arith.constant 0 : index
    %1 = vector.load %arg2[%c0_1, %c0_2] : memref<8x3xf32, #tpu.memory_space<vmem>>, vector<8x3xf32>
    %2 = vector.extract_strided_slice %1 {offsets = [0, 0], sizes = [8, 1], strides = [1, 1]} : vector<8x3xf32> to vector<8x1xf32>
    %3 = vector.extract_strided_slice %1 {offsets = [0, 1], sizes = [8, 1], strides = [1, 1]} : vector<8x3xf32> to vector<8x1xf32>
    %4 = vector.extract_strided_slice %1 {offsets = [0, 2], sizes = [8, 1], strides = [1, 1]} : vector<8x3xf32> to vector<8x1xf32>
    %5 = arith.mulf %0, %0 : vector<8x256xf32>
    %cst = arith.constant dense<0.000000e+00> : vector<8xf32>
    %6 = vector.multi_reduction <add>, %5, %cst [1] : vector<8x256xf32> to vector<8xf32>
    %7 = vector.shape_cast %6 : vector<8xf32> to vector<8x1xf32>
    %cst_3 = arith.constant 2.560000e+02 : f32
    %8 = vector.broadcast %cst_3 : f32 to vector<8x1xf32>
    %9 = arith.divf %7, %8 : vector<8x1xf32>
    %cst_4 = arith.constant 9.99999997E-7 : f32
    %10 = vector.broadcast %cst_4 : f32 to vector<8x1xf32>
    %11 = arith.addf %9, %10 : vector<8x1xf32>
    %12 = math.rsqrt %11 : vector<8x1xf32>
    %13 = arith.mulf %2, %12 : vector<8x1xf32>
    %14 = vector.broadcast %13 : vector<8x1xf32> to vector<8x256xf32>
    %15 = arith.mulf %0, %14 : vector<8x256xf32>
    %16 = vector.broadcast %3 : vector<8x1xf32> to vector<8x256xf32>
    %17 = arith.addf %15, %16 : vector<8x256xf32>
    %18 = vector.broadcast %4 : vector<8x1xf32> to vector<8x256xf32>
    %19 = arith.maximumf %17, %18 : vector<8x256xf32>
    %c0_5 = arith.constant 0 : index
    %c0_6 = arith.constant 0 : index
    %20 = vector.load %arg3[%c0_5, %c0_6] : memref<8x256xf32, #tpu.memory_space<vmem>>, vector<8x256xf32>
    tpu.vector_store %arg3[%c0_5, %c0_6], %19 {strides = array<i32>} : memref<8x256xf32, #tpu.memory_space<vmem>>, vector<8x256xf32>,
    return
  }
  func.func @transform_0(%arg0: i32) -> (i32, i32) {
    %c0_i32 = arith.constant 0 : i32
    %c0_i32_0 = arith.constant 0 : i32
    return %arg0, %c0_i32 : i32, i32
  }
  func.func @transform_1(%arg0: i32) -> (i32, i32) {
    %c0_i32 = arith.constant 0 : i32
    %c0_i32_0 = arith.constant 0 : i32
    return %arg0, %c0_i32 : i32, i32
  }
  func.func @transform_2(%arg0: i32) -> (i32, i32) {
    %c0_i32 = arith.constant 0 : i32
    %c0_i32_0 = arith.constant 0 : i32
    return %arg0, %c0_i32 : i32, i32
  }
}

</mosaic_0001>

<bundles_post_ra>
// kernel: tpu_custom_call.1
= control target key start
LH: loop header
LB: loop body
LE: loop exit
PB: predicated region body
PF: predicated region fallthrough
CT: control target
= control target key end

     0   :  { %7 = vsyncpa [#allocation3], 0  ;;  %s180_s0 = inlined_call_operand.hbm [shape: f32[8,256], index: 0, kind: input, shape index: {}]   ;;  %s181_s1 = inlined_call_operand.vmem [shape: f32[8,3], index: 1, kind: input, shape index: {}]   ;;  %s182_s2 = inlined_call_operand.hbm [shape: f32[8,256], index: 2, kind: output, shape index: {}]  }
   0x1   :  { %8 = vsyncpa [#allocation4], 0  ;;  %s133_s9 = smov [#allocation2]   ;;  %s85_s13 = scalar_lea.hbm %s180_s0, 256 }
   0x2   :  { %s15_s10 = sshll.u32 %s133_s9, 4  ;;  %p86_p0 = scmp.ne.s32.totalorder %s180_s0, %s85_s13  ;;  %s16_s10 = int_to_ptr.vmem [resolvable:$true] %s15_s10 }
   0x3   :  { %p89_p1 = scmp.lt.u32.totalorder %s85_s13, %s180_s0 }
   0x5   :  { %p91_p2 = pnand %p89_p1, %p86_p0 }
   0x7   :  { %94 = shalt.err (!%p91_p2)
}
   0x8   :  { %s95_s18 = scalar_lea.vmem %s16_s10, 256  ;;  %p100_p4 = scmp.lt.s32.totalorder %s16_s10, %s16_s10 }
   0x9   :  { %p96_p3 = scmp.ne.s32.totalorder %s16_s10, %s95_s18  ;;  %p101_p5 = scmp.lt.s32.totalorder %s95_s18, %s95_s18 }
   0xb   :  { %p102_p6 = por %p101_p5, %p100_p4 }
   0xd   :  { %p103_p7 = pnand %p102_p6, %p96_p3 }
   0xf   :  { %106 = shalt.err (!%p103_p7)
}
  0x10   :  { %18 = dma.hbm_to_vmem [thread:$0]  %s180_s0, 256, %s16_s10, [#allocation3]  }
  0x11   :  { %129 = dma.done.wait [#allocation3], 256  }
  0x12   :  { %130 = vsyncadd [#allocation3], 4294967040  ;;  %v24_v0 = vld [vmem:[#allocation2] sm:$0xff]  ;;  %v25_v1 = vld [vmem:[#allocation2 + $0x8] sm:$0xff]  ;;  %v134_v6 = vmov 1   ;;  %v135_v7 = vmov 0  }
  0x13   :  { %v27_v2 = vmul.f32 %v24_v0, %v24_v0  ;;  %v28_v3 = vmul.f32 %v25_v1, %v25_v1  ;;  %v26_v5 = vld [vmem:[%s181_s1] sm:$0xff]  ;;  %80 = vset.pattern.permute.xlu1 %v134_v6  ;;  %79 = vset.pattern.permute.xlu0 %v135_v7  ;;  %v136_v8 = vmov 2   ;;  %s137_s0 = smov [#allocation5]  }
  0x14   :  { %46 = vperm.xlu1 %80, %v26_v5   ;;  %s65_s1 = sshll.u32 %s137_s0, 4  ;;  %s66_s1 = int_to_ptr.vmem [resolvable:$true] %s65_s1 }
  0x15   :  { %v29_v4 = vadd.f32 %v28_v3, %v27_v2  ;;  %s107_s23 = scalar_lea.vmem %s66_s1, 256  ;;  %p112_p9 = scmp.lt.s32.totalorder %s66_s1, %s66_s1 }
  0x16   :  { %p108_p8 = scmp.ne.s32.totalorder %s66_s1, %s107_s23  ;;  %p113_p10 = scmp.lt.s32.totalorder %s107_s23, %s107_s23 }
  0x17   :  { %30 = vadd.xlane.f32.xlu0 %v29_v4 }
  0x18   :  { %81 = vset.pattern.permute.xlu1 %v136_v8  ;;  %p114_p11 = por %p113_p10, %p112_p9 }
  0x19   :  { %52 = vperm.xlu1 %81, %v26_v5  }
  0x1a   :  { %p115_p12 = pnand %p114_p11, %p108_p8 }
  0x93   :  { %v47_v14 = vpop.permute.xlu1 %46 }
  0x98   :  { %v53_v18 = vpop.permute.xlu1 %52 }
  0xa4   :  { %v31_v9 = vpop.xlane.xlu0 %30 }
  0xa5   :  { %v33_v10 = vmul.f32 0.00390625, %v31_v9 }
  0xa7   :  { %v34_v11 = vadd.f32 1e-06, %v33_v10 }
  0xa9   :  { %83 = vrsqrt.f32 %v34_v11 }
  0xb3   :  { %v84_v12 = vpop.eup %83 }
  0xb4   :  { %v36_v13 = vmul.f32 %v84_v12, %v26_v5 }
  0xb6   :  { %39 = vperm.xlu0 %79, %v36_v13  }
  0xba   :  { %82 = vset.pattern.permute.xlu0 %v136_v8 }
 0x135   :  { %v40_v15 = vpop.permute.xlu0 %39 }
 0x136   :  { %v42_v16 = vmul.f32 %v40_v15, %v24_v0  ;;  %v43_v17 = vmul.f32 %v40_v15, %v25_v1 }
 0x138   :  { %v49_v19 = vadd.f32 %v47_v14, %v42_v16  ;;  %v50_v20 = vadd.f32 %v47_v14, %v43_v17 }
 0x13a   :  { %v55_v21 = vmax.f32 %v49_v19, %v53_v18  ;;  %v56_v22 = vmax.f32 %v50_v20, %v53_v18 }
 0x13c   :  { %57 = vst [vmem:[#allocation5] sm:$0xff] %v55_v21  ;;  %58 = vst [vmem:[#allocation5 + $0x8] sm:$0xff] %v56_v22 }
 0x13d   :  { %118 = shalt.err (!%p115_p12)
}
 0x13e   :  { %s119_s26 = scalar_lea.hbm %s182_s2, 256 }
 0x13f   :  { %p120_p13 = scmp.ne.s32.totalorder %s182_s2, %s119_s26  ;;  %p123_p0 = scmp.lt.u32.totalorder %s119_s26, %s182_s2 }
 0x141   :  { %p125_p1 = pnand %p123_p0, %p120_p13 }
 0x143   :  { %128 = shalt.err (!%p125_p1)
}
 0x144   :  { %68 = dma.vmem_to_hbm [thread:$0]  %s66_s1, 256, %s182_s2, [#allocation4]  }
 0x145   :  { %131 = dma.done.wait [#allocation4], 256  }
 0x146   :  { %132 = vsyncadd [#allocation4], 4294967040 }
 0x147   :  { %72 = vsyncpa [#allocation3], 1 }
 0x148   :  { %73 = vsyncpa [#allocation4], 1 }

</bundles_post_ra>
